<compile_context>
chip_gen: v7x
topology: tpu7x:2x2x1
jax: 0.10.0
libtpu: 0.0.40
codegen_flags: <defaults>
</compile_context>

<pallas_src>
import jax
import jax.numpy as jnp
from jax import lax
from jax.experimental import pallas as pl
from jax.experimental.pallas import tpu as pltpu


def _round_up(x: int, m: int) -> int:
    return ((x + m - 1) // m) * m


def _linear_kernel(x_ref, w_ref, b_ref, o_ref):
    """One batch tile of: logits = x @ W.T + b  (torch.nn.Linear semantics)."""
    x = x_ref[...]                      # (TM, F)
    w = w_ref[...]                      # (L, F)  -- native PyTorch Linear layout
    b = b_ref[...]                      # (1, L)  -- already f32
    # Contract over F with the RHS "transposed" inside the dot_general (maps
    # straight onto the MXU); avoids materializing weight.T in HBM.
    acc = lax.dot_general(
        x, w,
        dimension_numbers=(((1,), (1,)), ((), ())),
        preferred_element_type=jnp.float32)          # (TM, L), f32 accumulate
    o_ref[...] = (acc + b).astype(o_ref.dtype)


def ensemble_forward(model_outputs, weight, bias, *, tm_max: int = 1024):
    """Pallas equivalent of EnsembleModel.forward.

    model_outputs : (batch, num_labels * num_models)
    weight        : (num_labels, num_labels * num_models)  (PyTorch Linear layout)
    bias          : (num_labels,)
    returns       : (batch, num_labels), dtype of model_outputs
    """
    batch, in_features = model_outputs.shape
    num_labels, in_features_w = weight.shape
    assert in_features_w == in_features, "weight / input feature mismatch"

    out_dtype = model_outputs.dtype
    # Hoist the bias cast out of the kernel: one tiny f32 (1, L) operand.
    b2d = bias.reshape(1, num_labels).astype(jnp.float32)

    # Batch tile: largest multiple of 8 that is <= tm_max but not larger than
    # the (rounded-up) batch. At F=32, a 1024-row f32 x-tile is 128 KiB;
    # double-buffered x + out buffers stay well under 2 MiB total.
    tm = min(tm_max, _round_up(batch, 8))
    tm = max(8, (tm // 8) * 8)
    batch_pad = _round_up(batch, tm)
    x = model_outputs
    if batch_pad != batch:
        x = jnp.pad(x, ((0, batch_pad - batch), (0, 0)))
    grid = (batch_pad // tm,)

    itemsize = jnp.dtype(out_dtype).itemsize
    cost = pl.CostEstimate(
        flops=2 * batch_pad * in_features * num_labels,
        transcendentals=0,
        bytes_accessed=(x.size * x.dtype.itemsize
                        + weight.size * weight.dtype.itemsize
                        + b2d.size * b2d.dtype.itemsize
                        + batch_pad * num_labels * itemsize),
    )

    out = pl.pallas_call(
        _linear_kernel,
        out_shape=jax.ShapeDtypeStruct((batch_pad, num_labels), out_dtype),
        grid=grid,
        in_specs=[
            # x: tiled over batch only (F and L are small, untiled) ->
            # clean 1-D parallel loop, auto double-buffered.
            pl.BlockSpec((tm, in_features), lambda i: (i, 0)),
            # weight & bias: full block, constant index_map -> resident in
            # VMEM across all grid steps (no per-step re-DMA).
            pl.BlockSpec((num_labels, in_features), lambda i: (0, 0)),
            pl.BlockSpec((1, num_labels), lambda i: (0, 0)),
        ],
        out_specs=pl.BlockSpec((tm, num_labels), lambda i: (i, 0)),
        compiler_params=pltpu.CompilerParams(
            # Batch axis is embarrassingly parallel -> megacore sharding on v7x.
            dimension_semantics=("parallel",),
        ),
        cost_estimate=cost,
    )(x, weight, b2d)

    return out[:batch] if batch_pad != batch else out


if __name__ == "__main__":
    # Shapes consistent with the module: in_features = num_labels * num_models.
    num_labels = 8
    num_models = 4
    in_features = num_labels * num_models

    key = jax.random.PRNGKey(0)
    k_x, k_w, k_b, k_x2 = jax.random.split(key, 4)

    # Deterministic init (mimics nn.Linear uniform(-1/sqrt(fan_in), 1/sqrt(fan_in))).
    bound = 1.0 / jnp.sqrt(jnp.float32(in_features))
    weight = jax.random.uniform(k_w, (num_labels, in_features), jnp.float32,
                                minval=-bound, maxval=bound)
    bias = jax.random.uniform(k_b, (num_labels,), jnp.float32,
                              minval=-bound, maxval=bound)

    # Case 1: small batch, single grid step.
    batch = 8
    model_outputs = jax.random.normal(k_x, (batch, in_features), jnp.float32)
    logits = jax.block_until_ready(ensemble_forward(model_outputs, weight, bias))
    ref = model_outputs @ weight.T + bias
    assert logits.shape == (batch, num_labels)
    assert jnp.allclose(logits, ref, atol=1e-5, rtol=1e-5)

    # Case 2: batch not a multiple of the tile -> exercises padding + a
    # multi-step pipelined grid (and the megacore split on v7x).
    batch2 = 200
    x2 = jax.random.normal(k_x2, (batch2, in_features), jnp.float32)
    logits2 = jax.block_until_ready(ensemble_forward(x2, weight, bias, tm_max=64))
    ref2 = x2 @ weight.T + bias
    assert logits2.shape == (batch2, num_labels)
    assert jnp.allclose(logits2, ref2, atol=1e-5, rtol=1e-5)

    print("KERNEL_OK")
</pallas_src>

<mosaic_0001>
module attributes {stable_mosaic.version = 11 : i64} {
  func.func @_linear_kernel(%arg0: i32, %arg1: memref<8x32xf32, #tpu.memory_space<vmem>>, %arg2: memref<8x32xf32, #tpu.memory_space<vmem>>, %arg3: memref<1x8xf32, #tpu.memory_space<vmem>>, %arg4: memref<8x8xf32, #tpu.memory_space<vmem>>) attributes {dimension_semantics = [#tpu.dimension_semantics<parallel>], iteration_bounds = array<i64: 1>, scalar_prefetch = 0 : i64, scratch_operands = 0 : i64, tpu.core_type = #tpu.core_type<tc>, window_params = [{transform_indices = @transform_0, window_bounds = array<i64: 8, 32>}, {pipeline_mode = #tpu.pipeline_mode<synchronous>, transform_indices = @transform_1, window_bounds = array<i64: 8, 32>}, {pipeline_mode = #tpu.pipeline_mode<synchronous>, transform_indices = @transform_2, window_bounds = array<i64: 1, 8>}, {transform_indices = @transform_3, window_bounds = array<i64: 8, 8>}]} {
    %c0 = arith.constant 0 : index
    %c0_0 = arith.constant 0 : index
    %0 = vector.load %arg1[%c0, %c0_0] : memref<8x32xf32, #tpu.memory_space<vmem>>, vector<8x32xf32>
    %c0_1 = arith.constant 0 : index
    %c0_2 = arith.constant 0 : index
    %1 = vector.load %arg2[%c0_1, %c0_2] : memref<8x32xf32, #tpu.memory_space<vmem>>, vector<8x32xf32>
    %c0_3 = arith.constant 0 : index
    %c0_4 = arith.constant 0 : index
    %2 = vector.load %arg3[%c0_3, %c0_4] : memref<1x8xf32, #tpu.memory_space<vmem>>, vector<1x8xf32>
    %cst = arith.constant dense<0.000000e+00> : vector<8x8xf32>
    %3 = tpu.matmul %0, %1, %cst {dimension_numbers = #tpu.dot_dimension_numbers<[1], [1], [0], [0], [0, 0, 1, 0], [], []>} : vector<8x32xf32>, vector<8x32xf32>, vector<8x8xf32> -> vector<8x8xf32>
    %4 = vector.broadcast %2 : vector<1x8xf32> to vector<8x8xf32>
    %5 = arith.addf %3, %4 : vector<8x8xf32>
    %c0_5 = arith.constant 0 : index
    %c0_6 = arith.constant 0 : index
    %6 = vector.load %arg4[%c0_5, %c0_6] : memref<8x8xf32, #tpu.memory_space<vmem>>, vector<8x8xf32>
    tpu.vector_store %arg4[%c0_5, %c0_6], %5 {strides = array<i32>} : memref<8x8xf32, #tpu.memory_space<vmem>>, vector<8x8xf32>,
    return
  }
  func.func @transform_0(%arg0: i32) -> (i32, i32) {
    %c0_i32 = arith.constant 0 : i32
    %c0_i32_0 = arith.constant 0 : i32
    return %arg0, %c0_i32 : i32, i32
  }
  func.func @transform_1(%arg0: i32) -> (i32, i32) {
    %c0_i32 = arith.constant 0 : i32
    %c0_i32_0 = arith.constant 0 : i32
    %c0_i32_1 = arith.constant 0 : i32
    return %c0_i32, %c0_i32_0 : i32, i32
  }
  func.func @transform_2(%arg0: i32) -> (i32, i32) {
    %c0_i32 = arith.constant 0 : i32
    %c0_i32_0 = arith.constant 0 : i32
    %c0_i32_1 = arith.constant 0 : i32
    return %c0_i32, %c0_i32_0 : i32, i32
  }
  func.func @transform_3(%arg0: i32) -> (i32, i32) {
    %c0_i32 = arith.constant 0 : i32
    %c0_i32_0 = arith.constant 0 : i32
    return %arg0, %c0_i32 : i32, i32
  }
}

</mosaic_0001>

<bundles_post_ra>
// kernel: tpu_custom_call.1
= control target key start
LH: loop header
LB: loop body
LE: loop exit
PB: predicated region body
PF: predicated region fallthrough
CT: control target
= control target key end

     0   :  { %8 = vsyncpa [#allocation3], 0  ;;  %s294_s0 = inlined_call_operand.hbm [shape: f32[8,32], index: 0, kind: input, shape index: {}]   ;;  %s295_s1 = inlined_call_operand.hbm [shape: f32[8,32], index: 1, kind: input, shape index: {}]   ;;  %s296_s2 = inlined_call_operand.vmem [shape: f32[1,8], index: 2, kind: input, shape index: {}]   ;;  %s297_s3 = inlined_call_operand.hbm [shape: f32[8,8], index: 3, kind: output, shape index: {}]  }
   0x1   :  { %9 = vsyncpa [#allocation6], 0 }
   0x2   :  { %10 = vsyncpa [#allocation4], 0  ;;  %s230_s12 = smov [#allocation2]   ;;  %s231_s14 = smov [#allocation5]  }
   0x3   :  { %s17_s13 = sshll.u32 %s230_s12, 4  ;;  %s27_s15 = sshll.u32 %s231_s14, 4  ;;  %s18_s13 = int_to_ptr.vmem [resolvable:$true] %s17_s13  ;;  %s28_s15 = int_to_ptr.vmem [resolvable:$true] %s27_s15 }
   0x4   :  { %s158_s18 = scalar_lea.hbm %s294_s0, 128 }
   0x5   :  { %p159_p0 = scmp.ne.s32.totalorder %s294_s0, %s158_s18  ;;  %p162_p1 = scmp.lt.u32.totalorder %s158_s18, %s294_s0 }
   0x7   :  { %p164_p2 = pnand %p162_p1, %p159_p0 }
   0x9   :  { %167 = shalt.err (!%p164_p2)
}
   0xa   :  { %s168_s23 = scalar_lea.vmem %s18_s13, 128  ;;  %p173_p4 = scmp.lt.s32.totalorder %s18_s13, %s18_s13 }
   0xb   :  { %p169_p3 = scmp.ne.s32.totalorder %s18_s13, %s168_s23  ;;  %p174_p5 = scmp.lt.s32.totalorder %s168_s23, %s168_s23 }
   0xd   :  { %p175_p6 = por %p174_p5, %p173_p4 }
   0xf   :  { %p176_p7 = pnand %p175_p6, %p169_p3 }
  0x11   :  { %179 = shalt.err (!%p176_p7)
}
  0x12   :  { %20 = dma.hbm_to_vmem [thread:$0]  %s294_s0, 128, %s18_s13, [#allocation3]  }
  0x13   :  { %s180_s28 = scalar_lea.hbm %s295_s1, 128 }
  0x14   :  { %p181_p8 = scmp.ne.s32.totalorder %s295_s1, %s180_s28  ;;  %p184_p9 = scmp.lt.u32.totalorder %s180_s28, %s295_s1 }
  0x16   :  { %p186_p10 = pnand %p184_p9, %p181_p8 }
  0x18   :  { %189 = shalt.err (!%p186_p10)
}
  0x19   :  { %s190_s6 = scalar_lea.vmem %s28_s15, 128  ;;  %p195_p12 = scmp.lt.s32.totalorder %s28_s15, %s28_s15 }
  0x1a   :  { %p191_p11 = scmp.ne.s32.totalorder %s28_s15, %s190_s6  ;;  %p196_p13 = scmp.lt.s32.totalorder %s190_s6, %s190_s6 }
  0x1c   :  { %p197_p0 = por %p196_p13, %p195_p12 }
  0x1e   :  { %p198_p1 = pnand %p197_p0, %p191_p11 }
  0x20   :  { %201 = shalt.err (!%p198_p1)
}
  0x21   :  { %30 = dma.hbm_to_vmem [thread:$0]  %s295_s1, 128, %s28_s15, [#allocation6]  }
  0x22   :  { %224 = dma.done.wait [#allocation3], 128  }
  0x23   :  { %225 = vsyncadd [#allocation3], 4294967168 }
  0x24   :  { %226 = dma.done.wait [#allocation6], 128  }
  0x25   :  { %227 = vsyncadd [#allocation6], 4294967168  ;;  %v232_v0 = vmov 0.0   ;;  %vm233_vm0 = vmmov 0   ;;  %vm48_vm1 = vcmask 261120   ;;  %v40_v1 = vld [vmem:[#allocation5] sm:$0xff] }
  0x26   :  { %148 = vmatprep.subr.mxu0 %v232_v0  ;;  %150 = vmatprep.mubr.msk.f32.mxu0 %vm233_vm0, %v232_v0  ;;  %v39_v2 = vld [vmem:[#allocation2] sm:$0xff]  ;;  %s234_s10 = smov [#allocation7]   ;;  %vm125_vm2 = vcmask 64512  }
  0x27   :  { %149 = vmatpush3.xpose.msk.msra.mxu0 %vm48_vm1, %v40_v1  ;;  %v143_v3 = vld [vmem:[%s296_s2] ss:$0 sm:$0xff]  ;;  %s133_s11 = sshll.u32 %s234_s10, 4  ;;  %s134_s11 = int_to_ptr.vmem [resolvable:$true] %s133_s11 }
  0x28   :  { %s202_s1 = scalar_lea.vmem %s134_s11, 128  ;;  %p207_p3 = scmp.lt.s32.totalorder %s134_s11, %s134_s11 }
  0x29   :  { %p203_p2 = scmp.ne.s32.totalorder %s134_s11, %s202_s1  ;;  %p208_p4 = scmp.lt.s32.totalorder %s202_s1, %s202_s1 }
  0x2a   :  { %151 = vmatmul.mubr.msk.f32.vlgmr.msra.gmra.mrb[0].mxu0 %vm48_vm1, %v39_v2 }
  0x2b   :  { %p209_p5 = por %p208_p4, %p207_p3 }
  0x2d   :  { %p210_p6 = pnand %p209_p5, %p203_p2 }
  0xfd   :  { %v121_v4 = vpop.f32.mrb[0].mxu0 }
  0xfe   :  { %v122_v5 = vadd.f32 %v143_v3, %v121_v4  ;;  %v152_v6 = vpop.f32.mrb[1].mxu0 }
 0x100   :  { %126 = vst.msk [vmem:[#allocation7] sm:$0xff] %vm125_vm2, %v122_v5 }
 0x101   :  { %213 = shalt.err (!%p210_p6)
}
 0x102   :  { %s214_s14 = scalar_lea.hbm %s297_s3, 128 }
 0x103   :  { %p215_p7 = scmp.ne.s32.totalorder %s297_s3, %s214_s14  ;;  %p218_p8 = scmp.lt.u32.totalorder %s214_s14, %s297_s3 }
 0x105   :  { %p220_p9 = pnand %p218_p8, %p215_p7 }
 0x107   :  { %223 = shalt.err (!%p220_p9)
}
 0x108   :  { %136 = dma.vmem_to_hbm [thread:$0]  %s134_s11, 128, %s297_s3, [#allocation4]  }
 0x109   :  { %228 = dma.done.wait [#allocation4], 128  }
 0x10a   :  { %229 = vsyncadd [#allocation4], 4294967168 }
 0x10b   :  { %140 = vsyncpa [#allocation3], 1 }
 0x10c   :  { %141 = vsyncpa [#allocation6], 1 }
 0x10d   :  { %142 = vsyncpa [#allocation4], 1 }

</bundles_post_ra>
